<compile_context>
chip_gen: v5e
topology: v5e:2x2
jax: 0.10.0
libtpu: 0.0.40
codegen_flags: <defaults>
</compile_context>

<pallas_src>
import functools

import jax
import jax.numpy as jnp
from jax import lax
from jax.experimental import pallas as pl
from jax.experimental.pallas import tpu as pltpu


_LANE = 128
_SUBLANE = 8
# Per x input buffer (the pipeline double-buffers it, so ~2x this in flight).
# Budgeted against the *lane-padded* feature width so the real VMEM footprint
# stays well inside even v5e's 16 MiB default scoped-VMEM budget.
_TARGET_BLOCK_BYTES = 4 * 1024 * 1024


def _round_up(x, m):
    return ((x + m - 1) // m) * m


def _linreg_mxu_kernel(x_ref, w_ref, o_ref):
    """Small/medium-D path: contraction on the MXU.

    x_ref: (tb, D) streamed batch tile; w_ref: (1, D) resident weight row
    (PyTorch layout); o_ref: (1, 1, tb) lane-dense output block.
    """
    d = w_ref.shape[-1]
    # Sublane-broadcast the weight row to 8 rows so the MXU sees a standard
    # (8, K) x (tb, K)^T contraction (same dimension_numbers as flash-attn
    # q @ k^T). The (8, tb) result is already lane-dense -> no relayout.
    w = jnp.broadcast_to(w_ref[...], (_SUBLANE, d))
    y = lax.dot_general(
        w, x_ref[...],
        dimension_numbers=(((1,), (1,)), ((), ())),
        preferred_element_type=jnp.float32,
    )                                              # (8, tb), rows identical
    o_ref[...] = y[0:1].reshape(o_ref.shape).astype(o_ref.dtype)


def _linreg_reduce_kernel(x_ref, w_ref, o_ref, acc_ref, *, d_total, tk):
    """Large-D path: VPU multiply + XLU lane reduce, K-tiled with f32 accumulator.

    x_ref: (tb, tk); w_ref: (1, tk); o_ref / acc_ref: (1, 1, tb).
    Grid = (batch tiles ["parallel"], feature tiles ["arbitrary"]).
    """
    k = pl.program_id(1)

    @pl.when(k == 0)
    def _():
        acc_ref[...] = jnp.zeros_like(acc_ref)

    x = x_ref[...].astype(jnp.float32)
    w = w_ref[...].astype(jnp.float32)
    prod = x * w
    if d_total % tk != 0:
        # The last K block is partial: its out-of-range lanes hold undefined
        # data in *both* operands, so zero the product there before reducing.
        limit = d_total - k * tk            # >= tk on every non-last block
        lane = lax.broadcasted_iota(jnp.int32, prod.shape, 1)
        prod = jnp.where(lane < limit, prod, 0.0)
    acc_ref[...] += jnp.sum(prod, axis=-1).reshape(acc_ref.shape)

    @pl.when(k == pl.num_programs(1) - 1)
    def _():
        o_ref[...] = acc_ref[...].astype(o_ref.dtype)


def _plan_tiles(batch, dim, itemsize, mxu_max_d, tile_rows, tile_cols):
    """Pick (tb, tk, use_mxu) against the lane-padded VMEM footprint."""
    use_mxu = dim <= mxu_max_d

    # Feature (K) tile. The MXU path keeps the whole feature dim resident; the
    # reduce path K-tiles only when even a 128-row block of the padded feature
    # dim would exceed the per-buffer budget.
    if tile_cols is not None and not use_mxu:
        tk = min(dim, _round_up(max(1, int(tile_cols)), _LANE))
    elif use_mxu or _LANE * _round_up(dim, _LANE) * itemsize <= _TARGET_BLOCK_BYTES:
        tk = dim
    else:
        tk = max(_LANE,
                 (_TARGET_BLOCK_BYTES // (_LANE * itemsize)) // _LANE * _LANE)
        tk = min(tk, dim)
    tk_pad = _round_up(tk, _LANE)

    # Batch tile, sized against the padded lane width (not logical D).
    if tile_rows is not None:
        tb = int(tile_rows)
    else:
        tb = max(_SUBLANE, _TARGET_BLOCK_BYTES // (tk_pad * itemsize))
        if tb >= _LANE:
            tb = (tb // _LANE) * _LANE
        else:
            tb = max(_SUBLANE, (tb // _SUBLANE) * _SUBLANE)
        tb = min(tb, _round_up(batch, _SUBLANE))
        if batch >= 2 * _SUBLANE:
            # Keep >= 2 batch tiles so both v7x TensorCores get work under the
            # "parallel" grid axis (each TC has its own VMEM; this is free).
            tb = min(tb, _round_up(-(-batch // 2), _SUBLANE))
    assert tb > 0 and tb % _SUBLANE == 0, tb
    return tb, tk, use_mxu


def _vmem_limit_bytes(tb, tk, itemsize, use_mxu):
    """Explicit scoped-VMEM request from the real (padded, double-buffered) footprint."""
    tk_pad = _round_up(tk, _LANE)
    tb_lane = _round_up(tb, _LANE)
    x_bytes = 2 * tb * tk_pad * itemsize                # double-buffered x tile
    w_bytes = 2 * _SUBLANE * tk_pad * itemsize          # (1, tk) weight block
    o_bytes = 2 * _SUBLANE * tb_lane * max(itemsize, 4)  # (1, 1, tb) out block
    acc_bytes = 0 if use_mxu else _SUBLANE * tb_lane * 4
    total = x_bytes + w_bytes + o_bytes + acc_bytes
    return int(min(max(total + (8 << 20), 16 << 20), 112 << 20))


def linreg_forward(x, weight, *, tile_rows=None, tile_cols=None,
                   mxu_max_d=256, min_pallas_elements=1 << 20):
    """y = x @ weight.T for PyTorch nn.Linear(D, 1, bias=False) weights.

    x: (B, D); weight: (1, D) in PyTorch layout. Returns (B, 1).

    Problems with B*D < min_pallas_elements take the plain XLA dot (launch
    overhead dominates there). D <= mxu_max_d uses the MXU contraction (the
    XLU lane-reduce saturates before HBM on v6e/v7x for small D); larger D
    uses the K-tiled VPU+XLU reduce path, which is already HBM-bound.
    """
    B, D = x.shape
    assert weight.shape == (1, D), weight.shape

    if B * D < min_pallas_elements:
        return x @ weight.T  # XLA fast path for tiny problems.

    itemsize = jnp.dtype(x.dtype).itemsize
    tb, tk, use_mxu = _plan_tiles(B, D, itemsize, mxu_max_d, tile_rows, tile_cols)
    nb = pl.cdiv(B, tb)
    vmem_limit = _vmem_limit_bytes(tb, tk, itemsize, use_mxu)

    # NOTE: the last batch block (and, on the reduce path, the last feature
    # block) may be partial; batch-axis garbage only reaches output rows that
    # are sliced off below, and feature-axis garbage is masked in-kernel.
    if use_mxu:
        kernel = _linreg_mxu_kernel
        grid = (nb,)
        in_specs = [
            pl.BlockSpec((tb, D), lambda i: (i, 0)),     # streamed batch tile
            pl.BlockSpec((1, D), lambda i: (0, 0)),      # resident weight row
        ]
        out_specs = pl.BlockSpec((1, 1, tb), lambda i: (i, 0, 0))
        scratch_shapes = []
        dimension_semantics = ("parallel",)
    else:
        nk = pl.cdiv(D, tk)
        kernel = functools.partial(_linreg_reduce_kernel, d_total=D, tk=tk)
        grid = (nb, nk)
        in_specs = [
            pl.BlockSpec((tb, tk), lambda i, k: (i, k)),
            pl.BlockSpec((1, tk), lambda i, k: (0, k)),
        ]
        out_specs = pl.BlockSpec((1, 1, tb), lambda i, k: (i, 0, 0))
        scratch_shapes = [pltpu.VMEM((1, 1, tb), jnp.float32)]
        dimension_semantics = ("parallel", "arbitrary")

    out = pl.pallas_call(
        kernel,
        out_shape=jax.ShapeDtypeStruct((nb, 1, tb), x.dtype),
        grid_spec=pltpu.PrefetchScalarGridSpec(
            num_scalar_prefetch=0,
            grid=grid,
            in_specs=in_specs,
            out_specs=out_specs,
            scratch_shapes=scratch_shapes,
        ),
        compiler_params=pltpu.CompilerParams(
            dimension_semantics=dimension_semantics,
            vmem_limit_bytes=vmem_limit,
        ),
    )(x, weight)

    # (nb, 1, tb) lane-dense slab -> (nb*tb, 1) -> drop the partial-tile tail.
    return out.reshape(nb * tb, 1)[:B]


if __name__ == "__main__":
    key = jax.random.PRNGKey(0)
    k_x, k_w, k_x2, k_x3, k_w3 = jax.random.split(key, 5)

    def ref_forward(xa, wa):
        # Pure-VPU reference (avoids MXU precision differences in the check).
        return jnp.sum(xa * wa, axis=-1, keepdims=True)

    # --- Module-sized case: B=8, D=cfg.linreg_dim_data=32 (MXU path).
    B, D = 8, 32
    x = jax.random.normal(k_x, (B, D), dtype=jnp.float32)
    bound = 1.0 / jnp.sqrt(jnp.float32(D))
    weight = jax.random.uniform(k_w, (1, D), jnp.float32, -bound, bound)

    out = jax.block_until_ready(linreg_forward(x, weight, min_pallas_elements=0))
    assert out.shape == (B, 1), out.shape
    assert jnp.allclose(out, ref_forward(x, weight), atol=1e-4, rtol=1e-4)

    # Default threshold routes this tiny problem to the XLA fast path.
    out_fb = jax.block_until_ready(linreg_forward(x, weight))
    assert jnp.allclose(out_fb, ref_forward(x, weight), atol=1e-4, rtol=1e-4)

    # --- Multi-tile + ragged batch (no wrapper pad), MXU path.
    B2 = 300
    x2 = jax.random.normal(k_x2, (B2, D), dtype=jnp.float32)
    out2 = jax.block_until_ready(
        linreg_forward(x2, weight, tile_rows=128, min_pallas_elements=0))
    assert out2.shape == (B2, 1), out2.shape
    assert jnp.allclose(out2, ref_forward(x2, weight), atol=1e-4, rtol=1e-4)

    # --- Large-D reduce path: K-tiled f32 accumulator, ragged batch & feature tiles.
    B3, D3 = 160, 700
    x3 = jax.random.normal(k_x3, (B3, D3), dtype=jnp.float32)
    bound3 = 1.0 / jnp.sqrt(jnp.float32(D3))
    weight3 = jax.random.uniform(k_w3, (1, D3), jnp.float32, -bound3, bound3)
    out3 = jax.block_until_ready(
        linreg_forward(x3, weight3, tile_cols=256, min_pallas_elements=0))
    assert out3.shape == (B3, 1), out3.shape
    assert jnp.allclose(out3, ref_forward(x3, weight3), atol=1e-4, rtol=1e-4)

    print("KERNEL_OK")
</pallas_src>

<mosaic_0001>
module attributes {stable_mosaic.version = 11 : i64} {
  func.func @_linreg_mxu_kernel(%arg0: i32, %arg1: memref<8x32xf32, #tpu.memory_space<vmem>>, %arg2: memref<1x32xf32, #tpu.memory_space<vmem>>, %arg3: memref<1x1x8xf32, #tpu.memory_space<vmem>>) attributes {dimension_semantics = [#tpu.dimension_semantics<parallel>], iteration_bounds = array<i64: 1>, scalar_prefetch = 0 : i64, scratch_operands = 0 : i64, tpu.core_type = #tpu.core_type<tc>, window_params = [{transform_indices = @transform_0, window_bounds = array<i64: 8, 32>}, {pipeline_mode = #tpu.pipeline_mode<synchronous>, transform_indices = @transform_1, window_bounds = array<i64: 1, 32>}, {transform_indices = @transform_2, window_bounds = array<i64: 1, 1, 8>}]} {
    %c0 = arith.constant 0 : index
    %c0_0 = arith.constant 0 : index
    %0 = vector.load %arg2[%c0, %c0_0] : memref<1x32xf32, #tpu.memory_space<vmem>>, vector<1x32xf32>
    %1 = vector.shape_cast %0 : vector<1x32xf32> to vector<1x32xf32>
    %2 = vector.broadcast %1 : vector<1x32xf32> to vector<8x32xf32>
    %c0_1 = arith.constant 0 : index
    %c0_2 = arith.constant 0 : index
    %3 = vector.load %arg1[%c0_1, %c0_2] : memref<8x32xf32, #tpu.memory_space<vmem>>, vector<8x32xf32>
    %cst = arith.constant dense<0.000000e+00> : vector<8x8xf32>
    %4 = tpu.matmul %2, %3, %cst {dimension_numbers = #tpu.dot_dimension_numbers<[1], [1], [0], [0], [0, 0, 1, 0], [], []>} : vector<8x32xf32>, vector<8x32xf32>, vector<8x8xf32> -> vector<8x8xf32>
    %5 = vector.extract_strided_slice %4 {offsets = [0, 0], sizes = [1, 8], strides = [1, 1]} : vector<8x8xf32> to vector<1x8xf32>
    %6 = vector.shape_cast %5 : vector<1x8xf32> to vector<1x1x8xf32>
    %c0_3 = arith.constant 0 : index
    %c0_4 = arith.constant 0 : index
    %c0_5 = arith.constant 0 : index
    %7 = vector.load %arg3[%c0_3, %c0_4, %c0_5] : memref<1x1x8xf32, #tpu.memory_space<vmem>>, vector<1x1x8xf32>
    tpu.vector_store %arg3[%c0_3, %c0_4, %c0_5], %6 {strides = array<i32>} : memref<1x1x8xf32, #tpu.memory_space<vmem>>, vector<1x1x8xf32>,
    return
  }
  func.func @transform_0(%arg0: i32) -> (i32, i32) {
    %c0_i32 = arith.constant 0 : i32
    %c0_i32_0 = arith.constant 0 : i32
    return %arg0, %c0_i32 : i32, i32
  }
  func.func @transform_1(%arg0: i32) -> (i32, i32) {
    %c0_i32 = arith.constant 0 : i32
    %c0_i32_0 = arith.constant 0 : i32
    %c0_i32_1 = arith.constant 0 : i32
    return %c0_i32, %c0_i32_0 : i32, i32
  }
  func.func @transform_2(%arg0: i32) -> (i32, i32, i32) {
    %c0_i32 = arith.constant 0 : i32
    %c0_i32_0 = arith.constant 0 : i32
    %c0_i32_1 = arith.constant 0 : i32
    return %arg0, %c0_i32, %c0_i32_0 : i32, i32, i32
  }
}

</mosaic_0001>

<bundles_post_ra>
// kernel: tpu_custom_call.1
= control target key start
LH: loop header
LB: loop body
LE: loop exit
PB: predicated region body
PF: predicated region fallthrough
CT: control target
= control target key end

     0   :  { %7 = vsyncpa [#allocation3], 0  ;;  %s201_s0 = inlined_call_operand.hbm [shape: f32[8,32], index: 0, kind: input, shape index: {}]   ;;  %s202_s1 = inlined_call_operand.hbm [shape: f32[1,32], index: 1, kind: input, shape index: {}]   ;;  %s203_s2 = inlined_call_operand.hbm [shape: f32[1,1,8], index: 2, kind: output, shape index: {}]  }
   0x1   :  { %8 = vsyncpa [#allocation6], 0 }
   0x2   :  { %9 = vsyncpa [#allocation4], 0  ;;  %s15_s11 = sshll.u32 %s201_s0, 4  ;;  %s174_s12 = smov [#allocation2]   ;;  %s16_s11 = int_to_ptr.hbm [resolvable:$true] %s15_s11 }
   0x3   :  { %s17_s13 = sshll.u32 %s174_s12, 4  ;;  %s26_s16 = sshll.u32 %s202_s1, 4  ;;  %s18_s13 = int_to_ptr.vmem [resolvable:$true] %s17_s13  ;;  %s27_s16 = int_to_ptr.hbm [resolvable:$true] %s26_s16 }
   0x4   :  { %20 = dma.hbm_to_vmem [thread:$0]  %s16_s11, 128, %s18_s13, [#allocation3]  }
   0x5   :  { %s175_s17 = smov [#allocation5]  }
   0x6   :  { %s28_s18 = sshll.u32 %s175_s17, 4  ;;  %s29_s18 = int_to_ptr.vmem [resolvable:$true] %s28_s18 }
   0x7   :  { %31 = dma.hbm_to_vmem [thread:$0]  %s27_s16, 16, %s29_s18, [#allocation6]  }
   0x8   :  { %168 = dma.done.wait [#allocation3], 128  }
   0x9   :  { %169 = vsyncadd [#allocation3], 4294967168 }
   0xa   :  { %170 = dma.done.wait [#allocation6], 16  }
   0xb   :  { %171 = vsyncadd [#allocation6], 4294967280  ;;  %vm44_vm0 = vcmask 261120   ;;  %v43_v0 = vld [vmem:[#allocation2] sm:$0xff]  ;;  %v95_v1 = vld [vmem:[#allocation5] ss:$0 sm:$0xff] }
   0xc   :  { %90 = vmatpush.xpose.msk.msra.mxu0 %vm44_vm0, %v43_v0  ;;  %s176_s0 = smov [#allocation7]   ;;  %s79_s1 = sshll.u32 %s203_s2, 4  ;;  %vm70_vm1 = vcmask 57344   ;;  %s80_s1 = int_to_ptr.hbm [resolvable:$true] %s79_s1 }
   0xd   :  { %s77_s19 = sshll.u32 %s176_s0, 4  ;;  %s78_s19 = int_to_ptr.vmem [resolvable:$true] %s77_s19 }
   0xf   :  { %91 = vmatmul.msk.f32.vlgmr.msra.gmra.mxu0 %vm44_vm0, %v95_v1 }
  0x8c   :  { %v67_v2 = vpop.f32.mrf.mxu0 }
  0x8d   :  { %71 = vst.msk [vmem:[#allocation7] sm:$0x1] %vm70_vm1, %v67_v2 }
  0x8e   :  { %82 = dma.vmem_to_hbm [thread:$0]  %s78_s19, 16, %s80_s1, [#allocation4]  }
  0x8f   :  { %172 = dma.done.wait [#allocation4], 16  }
  0x90   :  { %173 = vsyncadd [#allocation4], 4294967280 }
  0x91   :  { %87 = vsyncpa [#allocation3], 1 }
  0x92   :  { %88 = vsyncpa [#allocation6], 1 }
  0x93   :  { %89 = vsyncpa [#allocation4], 1 }

</bundles_post_ra>
